<compile_context>
chip_gen: v6e
topology: v6e:2x2x1
jax: 0.10.0
libtpu: 0.0.40
codegen_flags: <defaults>
</compile_context>

<pallas_src>
import jax
import jax.numpy as jnp
from jax.experimental import pallas as pl
from jax.experimental.pallas import tpu as pltpu

IN_F = 1 * 8
H1, H2, H3, OUT_F = 128, 256, 128, 1


def _mlp_kernel(x_ref,
                w1_ref, b1_ref,
                w2_ref, b2_ref,
                w3_ref, b3_ref,
                w4_ref, b4_ref,
                o_ref):
    # bf16 MXU matmuls with f32 accumulation; biases/ReLU in f32.
    x = x_ref[...].astype(jnp.bfloat16)

    h = jnp.dot(x, w1_ref[...], preferred_element_type=jnp.float32) + b1_ref[...]
    h = jnp.maximum(h, 0.0)

    h = jnp.dot(h.astype(jnp.bfloat16), w2_ref[...],
                preferred_element_type=jnp.float32) + b2_ref[...]
    h = jnp.maximum(h, 0.0)

    h = jnp.dot(h.astype(jnp.bfloat16), w3_ref[...],
                preferred_element_type=jnp.float32) + b3_ref[...]
    h = jnp.maximum(h, 0.0)

    # Final layer has N=1: skip the degenerate MXU matmul and use the VPU/XLU
    # (multiply by the (1,128) weight row, reduce along lanes).
    y = jnp.sum(h * w4_ref[...], axis=-1, keepdims=True) + b4_ref[...]

    o_ref[...] = y.astype(o_ref.dtype)


def _choose_tm(batch, max_tm=1024):
    """Batch tile: multiple of 8, capped so intermediates stay small in VMEM."""
    tm = ((batch + 7) // 8) * 8
    return max(8, min(max_tm, tm))


def annet_forward(x, params):
    """x: (B, ...) with prod(...) == 8, matching torch's x.view(B, -1)."""
    B = x.shape[0]
    x2d = x.reshape(B, -1)
    assert x2d.shape[1] == IN_F, f"expected {IN_F} flattened features"

    (w1, b1), (w2, b2), (w3, b3), (w4, b4) = params

    # Weights for the MXU layers in bf16 (halves weight VMEM/HBM bytes);
    # biases stay f32 and are added after the f32 accumulation.
    w1b = w1.astype(jnp.bfloat16)
    w2b = w2.astype(jnp.bfloat16)
    w3b = w3.astype(jnp.bfloat16)
    w4r = w4.reshape(1, H3).astype(jnp.float32)   # used on the VPU, keep f32

    TM = _choose_tm(B)
    grid = (pl.cdiv(B, TM),)

    def resident(shape):
        # Whole-array block, constant index_map -> fetched once, stays in VMEM.
        return pl.BlockSpec(shape, lambda i: tuple(0 for _ in shape))

    out = pl.pallas_call(
        _mlp_kernel,
        out_shape=jax.ShapeDtypeStruct((B, OUT_F), jnp.float32),
        grid=grid,
        in_specs=[
            pl.BlockSpec((TM, IN_F), lambda i: (i, 0)),   # streamed x tiles
            resident((IN_F, H1)), resident((1, H1)),
            resident((H1, H2)), resident((1, H2)),
            resident((H2, H3)), resident((1, H3)),
            resident((1, H3)), resident((1, OUT_F)),
        ],
        out_specs=pl.BlockSpec((TM, OUT_F), lambda i: (i, 0)),
        compiler_params=pltpu.CompilerParams(
            dimension_semantics=("parallel",),
            vmem_limit_bytes=32 * 1024 * 1024),
    )(x2d, w1b, b1, w2b, b2, w3b, b3, w4r, b4)
    return out


def init_params(key):
    """Deterministic init mimicking torch.nn.Linear default
    (U[-1/sqrt(fan_in), +1/sqrt(fan_in)]); weights stored as (in, out)."""
    dims = [(IN_F, H1), (H1, H2), (H2, H3), (H3, OUT_F)]
    params = []
    for (fan_in, fan_out) in dims:
        key, kw, kb = jax.random.split(key, 3)
        bound = 1.0 / jnp.sqrt(float(fan_in))
        w = jax.random.uniform(kw, (fan_in, fan_out), jnp.float32, -bound, bound)
        b = jax.random.uniform(kb, (1, fan_out), jnp.float32, -bound, bound)
        params.append((w, b))
    return params


def reference_forward(x, params):
    """Pure-JAX reference mirroring the kernel's bf16-matmul / f32-accumulate
    numerics (same as the PyTorch module up to bf16 rounding)."""
    (w1, b1), (w2, b2), (w3, b3), (w4, b4) = params
    h = x.reshape(x.shape[0], -1).astype(jnp.float32)
    h = jnp.maximum(jnp.dot(h.astype(jnp.bfloat16), w1.astype(jnp.bfloat16),
                            preferred_element_type=jnp.float32) + b1, 0.0)
    h = jnp.maximum(jnp.dot(h.astype(jnp.bfloat16), w2.astype(jnp.bfloat16),
                            preferred_element_type=jnp.float32) + b2, 0.0)
    h = jnp.maximum(jnp.dot(h.astype(jnp.bfloat16), w3.astype(jnp.bfloat16),
                            preferred_element_type=jnp.float32) + b3, 0.0)
    return jnp.sum(h * w4.reshape(1, H3), axis=-1, keepdims=True) + b4


if __name__ == "__main__":
    key = jax.random.PRNGKey(0)
    key, kx = jax.random.split(key)

    # Small input consistent with the module: batch=2, flattens to 1*8 features.
    x = jax.random.normal(kx, (2, 1, 8), jnp.float32)

    params = init_params(key)

    out = annet_forward(x, params)
    out = jax.block_until_ready(out)

    ref = reference_forward(x, params)
    assert out.shape == (2, 1)
    assert jnp.allclose(out, ref, atol=1e-3, rtol=1e-3), "mismatch vs reference"

    print("KERNEL_OK")
</pallas_src>

<mosaic_0001>
module attributes {stable_mosaic.version = 11 : i64} {
  func.func @_mlp_kernel(%arg0: i32, %arg1: memref<8x8xf32, #tpu.memory_space<vmem>>, %arg2: memref<8x128xbf16, #tpu.memory_space<vmem>>, %arg3: memref<1x128xf32, #tpu.memory_space<vmem>>, %arg4: memref<128x256xbf16, #tpu.memory_space<vmem>>, %arg5: memref<1x256xf32, #tpu.memory_space<vmem>>, %arg6: memref<256x128xbf16, #tpu.memory_space<vmem>>, %arg7: memref<1x128xf32, #tpu.memory_space<vmem>>, %arg8: memref<1x128xf32, #tpu.memory_space<vmem>>, %arg9: memref<1x1xf32, #tpu.memory_space<vmem>>, %arg10: memref<8x1xf32, #tpu.memory_space<vmem>>) attributes {dimension_semantics = [#tpu.dimension_semantics<parallel>], iteration_bounds = array<i64: 1>, scalar_prefetch = 0 : i64, scratch_operands = 0 : i64, tpu.core_type = #tpu.core_type<tc>, window_params = [{transform_indices = @transform_0, window_bounds = array<i64: 8, 8>}, {pipeline_mode = #tpu.pipeline_mode<synchronous>, transform_indices = @transform_1, window_bounds = array<i64: 8, 128>}, {pipeline_mode = #tpu.pipeline_mode<synchronous>, transform_indices = @transform_2, window_bounds = array<i64: 1, 128>}, {pipeline_mode = #tpu.pipeline_mode<synchronous>, transform_indices = @transform_3, window_bounds = array<i64: 128, 256>}, {pipeline_mode = #tpu.pipeline_mode<synchronous>, transform_indices = @transform_4, window_bounds = array<i64: 1, 256>}, {pipeline_mode = #tpu.pipeline_mode<synchronous>, transform_indices = @transform_5, window_bounds = array<i64: 256, 128>}, {pipeline_mode = #tpu.pipeline_mode<synchronous>, transform_indices = @transform_6, window_bounds = array<i64: 1, 128>}, {pipeline_mode = #tpu.pipeline_mode<synchronous>, transform_indices = @transform_7, window_bounds = array<i64: 1, 128>}, {pipeline_mode = #tpu.pipeline_mode<synchronous>, transform_indices = @transform_8, window_bounds = array<i64: 1, 1>}, {transform_indices = @transform_9, window_bounds = array<i64: 8, 1>}]} {
    %c0 = arith.constant 0 : index
    %c0_0 = arith.constant 0 : index
    %0 = vector.load %arg1[%c0, %c0_0] : memref<8x8xf32, #tpu.memory_space<vmem>>, vector<8x8xf32>
    %1 = arith.truncf %0 : vector<8x8xf32> to vector<8x8xbf16>
    %c0_1 = arith.constant 0 : index
    %c0_2 = arith.constant 0 : index
    %2 = vector.load %arg2[%c0_1, %c0_2] : memref<8x128xbf16, #tpu.memory_space<vmem>>, vector<8x128xbf16>
    %cst = arith.constant dense<0.000000e+00> : vector<8x128xf32>
    %3 = tpu.matmul %1, %2, %cst {dimension_numbers = #tpu.dot_dimension_numbers<[1], [0], [0], [1], [0, 0, 1, 1], [], []>} : vector<8x8xbf16>, vector<8x128xbf16>, vector<8x128xf32> -> vector<8x128xf32>
    %c0_3 = arith.constant 0 : index
    %c0_4 = arith.constant 0 : index
    %4 = vector.load %arg3[%c0_3, %c0_4] : memref<1x128xf32, #tpu.memory_space<vmem>>, vector<1x128xf32>
    %5 = vector.broadcast %4 : vector<1x128xf32> to vector<8x128xf32>
    %6 = arith.addf %3, %5 : vector<8x128xf32>
    %cst_5 = arith.constant 0.000000e+00 : f32
    %7 = vector.broadcast %cst_5 : f32 to vector<8x128xf32>
    %8 = arith.maximumf %6, %7 : vector<8x128xf32>
    %9 = arith.truncf %8 : vector<8x128xf32> to vector<8x128xbf16>
    %c0_6 = arith.constant 0 : index
    %c0_7 = arith.constant 0 : index
    %10 = vector.load %arg4[%c0_6, %c0_7] : memref<128x256xbf16, #tpu.memory_space<vmem>>, vector<128x256xbf16>
    %cst_8 = arith.constant dense<0.000000e+00> : vector<8x256xf32>
    %11 = tpu.matmul %9, %10, %cst_8 {dimension_numbers = #tpu.dot_dimension_numbers<[1], [0], [0], [1], [0, 0, 1, 1], [], []>} : vector<8x128xbf16>, vector<128x256xbf16>, vector<8x256xf32> -> vector<8x256xf32>
    %c0_9 = arith.constant 0 : index
    %c0_10 = arith.constant 0 : index
    %12 = vector.load %arg5[%c0_9, %c0_10] : memref<1x256xf32, #tpu.memory_space<vmem>>, vector<1x256xf32>
    %13 = vector.broadcast %12 : vector<1x256xf32> to vector<8x256xf32>
    %14 = arith.addf %11, %13 : vector<8x256xf32>
    %cst_11 = arith.constant 0.000000e+00 : f32
    %15 = vector.broadcast %cst_11 : f32 to vector<8x256xf32>
    %16 = arith.maximumf %14, %15 : vector<8x256xf32>
    %17 = arith.truncf %16 : vector<8x256xf32> to vector<8x256xbf16>
    %c0_12 = arith.constant 0 : index
    %c0_13 = arith.constant 0 : index
    %18 = vector.load %arg6[%c0_12, %c0_13] : memref<256x128xbf16, #tpu.memory_space<vmem>>, vector<256x128xbf16>
    %cst_14 = arith.constant dense<0.000000e+00> : vector<8x128xf32>
    %19 = tpu.matmul %17, %18, %cst_14 {dimension_numbers = #tpu.dot_dimension_numbers<[1], [0], [0], [1], [0, 0, 1, 1], [], []>} : vector<8x256xbf16>, vector<256x128xbf16>, vector<8x128xf32> -> vector<8x128xf32>
    %c0_15 = arith.constant 0 : index
    %c0_16 = arith.constant 0 : index
    %20 = vector.load %arg7[%c0_15, %c0_16] : memref<1x128xf32, #tpu.memory_space<vmem>>, vector<1x128xf32>
    %21 = vector.broadcast %20 : vector<1x128xf32> to vector<8x128xf32>
    %22 = arith.addf %19, %21 : vector<8x128xf32>
    %cst_17 = arith.constant 0.000000e+00 : f32
    %23 = vector.broadcast %cst_17 : f32 to vector<8x128xf32>
    %24 = arith.maximumf %22, %23 : vector<8x128xf32>
    %c0_18 = arith.constant 0 : index
    %c0_19 = arith.constant 0 : index
    %25 = vector.load %arg8[%c0_18, %c0_19] : memref<1x128xf32, #tpu.memory_space<vmem>>, vector<1x128xf32>
    %26 = vector.broadcast %25 : vector<1x128xf32> to vector<8x128xf32>
    %27 = arith.mulf %24, %26 : vector<8x128xf32>
    %cst_20 = arith.constant dense<0.000000e+00> : vector<8xf32>
    %28 = vector.multi_reduction <add>, %27, %cst_20 [1] : vector<8x128xf32> to vector<8xf32>
    %29 = vector.shape_cast %28 : vector<8xf32> to vector<8x1xf32>
    %c0_21 = arith.constant 0 : index
    %c0_22 = arith.constant 0 : index
    %30 = vector.load %arg9[%c0_21, %c0_22] : memref<1x1xf32, #tpu.memory_space<vmem>>, vector<1x1xf32>
    %31 = vector.broadcast %30 : vector<1x1xf32> to vector<8x1xf32>
    %32 = arith.addf %29, %31 : vector<8x1xf32>
    %c0_23 = arith.constant 0 : index
    %c0_24 = arith.constant 0 : index
    %33 = vector.load %arg10[%c0_23, %c0_24] : memref<8x1xf32, #tpu.memory_space<vmem>>, vector<8x1xf32>
    tpu.vector_store %arg10[%c0_23, %c0_24], %32 {strides = array<i32>} : memref<8x1xf32, #tpu.memory_space<vmem>>, vector<8x1xf32>,
    return
  }
  func.func @transform_0(%arg0: i32) -> (i32, i32) {
    %c0_i32 = arith.constant 0 : i32
    %c0_i32_0 = arith.constant 0 : i32
    return %arg0, %c0_i32 : i32, i32
  }
  func.func @transform_1(%arg0: i32) -> (i32, i32) {
    %c0_i32 = arith.constant 0 : i32
    %c0_i32_0 = arith.constant 0 : i32
    %c0_i32_1 = arith.constant 0 : i32
    return %c0_i32, %c0_i32_0 : i32, i32
  }
  func.func @transform_2(%arg0: i32) -> (i32, i32) {
    %c0_i32 = arith.constant 0 : i32
    %c0_i32_0 = arith.constant 0 : i32
    %c0_i32_1 = arith.constant 0 : i32
    return %c0_i32, %c0_i32_0 : i32, i32
  }
  func.func @transform_3(%arg0: i32) -> (i32, i32) {
    %c0_i32 = arith.constant 0 : i32
    %c0_i32_0 = arith.constant 0 : i32
    %c0_i32_1 = arith.constant 0 : i32
    return %c0_i32, %c0_i32_0 : i32, i32
  }
  func.func @transform_4(%arg0: i32) -> (i32, i32) {
    %c0_i32 = arith.constant 0 : i32
    %c0_i32_0 = arith.constant 0 : i32
    %c0_i32_1 = arith.constant 0 : i32
    return %c0_i32, %c0_i32_0 : i32, i32
  }
  func.func @transform_5(%arg0: i32) -> (i32, i32) {
    %c0_i32 = arith.constant 0 : i32
    %c0_i32_0 = arith.constant 0 : i32
    %c0_i32_1 = arith.constant 0 : i32
    return %c0_i32, %c0_i32_0 : i32, i32
  }
  func.func @transform_6(%arg0: i32) -> (i32, i32) {
    %c0_i32 = arith.constant 0 : i32
    %c0_i32_0 = arith.constant 0 : i32
    %c0_i32_1 = arith.constant 0 : i32
    return %c0_i32, %c0_i32_0 : i32, i32
  }
  func.func @transform_7(%arg0: i32) -> (i32, i32) {
    %c0_i32 = arith.constant 0 : i32
    %c0_i32_0 = arith.constant 0 : i32
    %c0_i32_1 = arith.constant 0 : i32
    return %c0_i32, %c0_i32_0 : i32, i32
  }
  func.func @transform_8(%arg0: i32) -> (i32, i32) {
    %c0_i32 = arith.constant 0 : i32
    %c0_i32_0 = arith.constant 0 : i32
    %c0_i32_1 = arith.constant 0 : i32
    return %c0_i32, %c0_i32_0 : i32, i32
  }
  func.func @transform_9(%arg0: i32) -> (i32, i32) {
    %c0_i32 = arith.constant 0 : i32
    %c0_i32_0 = arith.constant 0 : i32
    return %arg0, %c0_i32 : i32, i32
  }
}

</mosaic_0001>

<bundles_post_ra>
// kernel: tpu_custom_call.1
= control target key start
LH: loop header
LB: loop body
LE: loop exit
PB: predicated region body
PF: predicated region fallthrough
CT: control target
= control target key end

     0   :  { %s797_s0 = inlined_call_operand.vmem [shape: f32[2,8], index: 0, kind: input, shape index: {}]   ;;  %s798_s1 = inlined_call_operand.hbm [shape: bf16[8,128], index: 1, kind: input, shape index: {}]   ;;  %s799_s2 = inlined_call_operand.vmem [shape: f32[1,128], index: 2, kind: input, shape index: {}]   ;;  %s800_s3 = inlined_call_operand.hbm [shape: bf16[128,256], index: 3, kind: input, shape index: {}]   ;;  %s801_s4 = inlined_call_operand.vmem [shape: f32[1,256], index: 4, kind: input, shape index: {}]   ;;  %s802_s5 = inlined_call_operand.hbm [shape: bf16[256,128], index: 5, kind: input, shape index: {}]   ;;  %s803_s6 = inlined_call_operand.vmem [shape: f32[1,128], index: 6, kind: input, shape index: {}]   ;;  %s804_s7 = inlined_call_operand.vmem [shape: f32[1,128], index: 7, kind: input, shape index: {}]   ;;  %s805_s8 = inlined_call_operand.<no memory space> [shape: f32[1,1], index: 8, kind: input, shape index: {}]   ;;  %s806_s9 = inlined_call_operand.vmem [shape: f32[2,1], index: 9, kind: output, shape index: {}]  }
   0x1   :  { %v14_v0 = vstv %s805_s8 }
   0x2   :  { %15 = vst [vmem:[#allocation2] sm:$0x1] %v14_v0 }
   0x3   :  { %16 = vsyncpa [#allocation4], 0 }
   0x4   :  { %17 = vsyncpa [#allocation6], 0  ;;  %s707_s11 = smov [#allocation5]  }
   0x5   :  { %s37_s12 = sshll.u32 %s707_s11, 4  ;;  %s38_s12 = int_to_ptr.vmem [resolvable:$true] %s37_s12 }
   0x6   :  { %s651_s13 = scalar_lea.vmem %s38_s12, 2048  ;;  %p656_p1 = scmp.lt.s32.totalorder %s38_s12, %s38_s12 }
   0x7   :  { %p652_p0 = scmp.ne.s32.totalorder %s38_s12, %s651_s13  ;;  %p657_p2 = scmp.lt.s32.totalorder %s651_s13, %s651_s13 }
   0x9   :  { %p658_p3 = por %p657_p2, %p656_p1 }
   0xb   :  { %p659_p4 = pnand %p658_p3, %p652_p0 }
   0xd   :  { %662 = shalt.err (!%p659_p4)
}
   0xe   :  { %s708_s14 = smov 128   ;;  %s709_s15 = smov 8  }
   0xf   :  { %43 = dma.hbm_to_vmem [thread:$0]  %s800_s3, 2048, %s38_s12, [#allocation6], %s708_s14, %s708_s14, %s709_s15  }
  0x10   :  { %s710_s8 = smov [#allocation3]   ;;  %s711_s19 = smov [#allocation7]  }
  0x11   :  { %s26_s18 = sshll.u32 %s710_s8, 4  ;;  %s51_s20 = sshll.u32 %s711_s19, 4  ;;  %s27_s18 = int_to_ptr.vmem [resolvable:$true] %s26_s18  ;;  %s52_s20 = int_to_ptr.vmem [resolvable:$true] %s51_s20 }
  0x12   :  { %s671_s21 = scalar_lea.vmem %s27_s18, 64  ;;  %p676_p6 = scmp.lt.s32.totalorder %s27_s18, %s27_s18 }
  0x13   :  { %p672_p5 = scmp.ne.s32.totalorder %s27_s18, %s671_s21  ;;  %p677_p7 = scmp.lt.s32.totalorder %s671_s21, %s671_s21 }
  0x15   :  { %p678_p8 = por %p677_p7, %p676_p6 }
  0x17   :  { %p679_p9 = pnand %p678_p8, %p672_p5 }
  0x19   :  { %682 = shalt.err (!%p679_p9)
}
  0x1a   :  { %29 = dma.hbm_to_vmem [thread:$0]  %s798_s1, 64, %s27_s18, [#allocation4]  }
  0x1b   :  { %s691_s24 = scalar_lea.vmem %s52_s20, 2048  ;;  %p696_p11 = scmp.lt.s32.totalorder %s52_s20, %s52_s20 }
  0x1c   :  { %p692_p10 = scmp.ne.s32.totalorder %s52_s20, %s691_s24  ;;  %p697_p12 = scmp.lt.s32.totalorder %s691_s24, %s691_s24 }
  0x1e   :  { %p698_p13 = por %p697_p12, %p696_p11 }
  0x20   :  { %p699_p0 = pnand %p698_p13, %p692_p10 }
  0x22   :  { %702 = shalt.err (!%p699_p0)
}
  0x23   :  { %s712_s3 = smov 64   ;;  %s713_s25 = smov 4  }
  0x24   :  { %57 = dma.hbm_to_vmem [thread:$0]  %s802_s5, 2048, %s52_s20, [#allocation6], %s712_s3, %s712_s3, %s713_s25  }
  0x25   :  { %703 = dma.done.wait [#allocation4], 64  }
  0x26   :  { %704 = vsyncadd [#allocation4], 4294967232 }
  0x27   :  { %705 = dma.done.wait [#allocation6], 4096  }
  0x28   :  { %706 = vsyncadd [#allocation6], 4294963200  ;;  %v714_v1 = vmov 0.0   ;;  %vm715_vm0 = vmmov 0   ;;  %vm88_vm1 = vcmask 1043456   ;;  %v74_v3 = vld [vmem:[%s797_s0] sm:$0xff]  ;;  %v152_v47 = vlaneseq }
  0x29   :  { %587 = vmatprep.subr.bf16.mxu0 %v714_v1  ;;  %589 = vmatprep.mubr.msk.bf16.mxu0 %vm715_vm0, %v714_v1  ;;  %v76_v2 = vld [vmem:[#allocation3] sm:$0xf]  ;;  %v75_v5 = vpack.c.bf16 %v74_v3, %v74_v3  ;;  %v605_v7 = vld [vmem:[#allocation5 + $0x70] ss:$8 sps:$4 sm:$0xff]   ;;  %vm84_vm2 = vcmask 64512   ;;  %v716_v22 = vmov 0  }
  0x2a   :  { %v90_v4 = vsel %vm88_vm1, %v76_v2, 0  ;;  %v603_v6 = vld [vmem:[#allocation5 + $0x74] ss:$8 sps:$4 sm:$0xff]   ;;  %v606_v8 = vld [vmem:[#allocation5 + $0x64] ss:$8 sps:$4 sm:$0xff]   ;;  %274 = vmatprep.mubr.bf16.mxu1 %v716_v22  ;;  %v153_v48 = vshrl.u32 %v152_v47, 7 }
  0x2b   :  { %588 = vmatpush3.bf16.msra.mxu0 %v90_v4  ;;  %242 = vmatprep.subr.bf16.mxu1 %v603_v6  ;;  %v608_v9 = vld [vmem:[#allocation5 + $0x60] ss:$8 sps:$4 sm:$0xff]   ;;  %v609_v10 = vld [vmem:[#allocation5 + $0x54] ss:$8 sps:$4 sm:$0xff]   ;;  %v611_v11 = vld [vmem:[#allocation5 + $0x50] ss:$8 sps:$4 sm:$0xff]  }
  0x2c   :  { %243 = vmatpush1.bf16.msra.mxu1 %v605_v7  ;;  %v612_v12 = vld [vmem:[#allocation5 + $0x44] ss:$8 sps:$4 sm:$0xff]   ;;  %v614_v13 = vld [vmem:[#allocation5 + $0x40] ss:$8 sps:$4 sm:$0xff]   ;;  %v615_v14 = vld [vmem:[#allocation5 + $0x34] ss:$8 sps:$4 sm:$0xff]  }
  0x2d   :  { %244 = vmatprep.subr.bf16.mxu1 %v606_v8  ;;  %v617_v15 = vld [vmem:[#allocation5 + $0x30] ss:$8 sps:$4 sm:$0xff]   ;;  %v618_v16 = vld [vmem:[#allocation5 + $0x24] ss:$8 sps:$4 sm:$0xff]   ;;  %v620_v17 = vld [vmem:[#allocation5 + $0x20] ss:$8 sps:$4 sm:$0xff]  }
  0x2e   :  { %590 = vmatmul.mubr.msk.bf16.vlgmr.msra.gmra.mxu0 %vm84_vm2, %v75_v5  ;;  %v621_v18 = vld [vmem:[#allocation5 + $0x14] ss:$8 sps:$4 sm:$0xff]   ;;  %v623_v19 = vld [vmem:[#allocation5 + $0x10] ss:$8 sps:$4 sm:$0xff]   ;;  %v624_v20 = vld [vmem:[#allocation5 + $0x4] ss:$8 sps:$4 sm:$0xff]  }
  0x2f   :  { %v626_v21 = vld [vmem:[#allocation5] ss:$8 sps:$4 sm:$0xff]   ;;  %v627_v23 = vld [vmem:[#allocation7 + $0x78] sm:$0xff]   ;;  %v629_v25 = vld [vmem:[#allocation7 + $0x70] sm:$0xff]   ;;  %v154_v49 = vsub.s32 0, %v153_v48  ;;  %v158_v51 = vsub.s32 1, %v153_v48 }
  0x30   :  { %245 = vmatpush1.bf16.msra.mxu1 %v608_v9  ;;  %v628_v24 = vld [vmem:[#allocation7 + $0x38] sm:$0xff]   ;;  %565 = vmatprep.subr.bf16.mxu0 %v627_v23  ;;  %v630_v26 = vld [vmem:[#allocation7 + $0x30] sm:$0xff]   ;;  %v631_v27 = vld [vmem:[#allocation7 + $0x68] sm:$0xff]   ;;  %vm481_vm3 = vcmask 7168  }
  0x31   :  { %246 = vmatprep.subr.bf16.mxu1 %v609_v10  ;;  %566 = vmatpush3.bf16.msra.mxu0 %v628_v24  ;;  %v632_v28 = vld [vmem:[#allocation7 + $0x28] sm:$0xff]   ;;  %v633_v29 = vld [vmem:[#allocation7 + $0x60] sm:$0xff]   ;;  %v635_v31 = vld [vmem:[#allocation7 + $0x58] sm:$0xff]  }
  0x32   :  { %567 = vmatprep.subr.bf16.mxu0 %v629_v25  ;;  %v634_v30 = vld [vmem:[#allocation7 + $0x20] sm:$0xff]   ;;  %v636_v32 = vld [vmem:[#allocation7 + $0x18] sm:$0xff]   ;;  %v637_v33 = vld [vmem:[#allocation7 + $0x50] sm:$0xff]  }
  0x33   :  { %v638_v34 = vld [vmem:[#allocation7 + $0x10] sm:$0xff]   ;;  %v526_v35 = vld [vmem:[%s799_s2] ss:$0 sm:$0xff]  ;;  %v639_v43 = vld [vmem:[#allocation7 + $0x48] sm:$0xff]  }
  0x34   :  { %247 = vmatpush1.bf16.msra.mxu1 %v611_v11  ;;  %v640_v44 = vld [vmem:[#allocation7 + $0x8] sm:$0xff]   ;;  %v641_v45 = vld [vmem:[#allocation7 + $0x40] sm:$0xff]   ;;  %v150_v50 = vld [vmem:[%s801_s4] sm:$0x3] }
  0x35   :  { %248 = vmatprep.subr.bf16.mxu1 %v612_v12  ;;  %568 = vmatpush3.bf16.msra.mxu0 %v630_v26  ;;  %v642_v46 = vld [vmem:[#allocation7] sm:$0xff]   ;;  %v155_v52 = vrot.slane %v150_v50, %v154_v49  ;;  %v159_v53 = vrot.slane %v150_v50, %v158_v51  ;;  %v544_v2 = vld [vmem:[%s803_s6] ss:$0 sm:$0xff] }
  0x36   :  { %569 = vmatprep.subr.bf16.mxu0 %v631_v27  ;;  %v561_v7 = vld [vmem:[%s804_s7] ss:$0 sm:$0xff] }
  0x37   :  { %v562_v10 = vld [vmem:[#allocation2] ss:$0 sm:$0xff] }
  0x38   :  { %249 = vmatpush1.bf16.msra.mxu1 %v614_v13 }
  0x39   :  { %250 = vmatprep.subr.bf16.mxu1 %v615_v14  ;;  %570 = vmatpush3.bf16.msra.mxu0 %v632_v28 }
  0x3a   :  { %571 = vmatprep.subr.bf16.mxu0 %v633_v29 }
  0x3c   :  { %251 = vmatpush1.bf16.msra.mxu1 %v617_v15 }
  0x3d   :  { %252 = vmatprep.subr.bf16.mxu1 %v618_v16  ;;  %572 = vmatpush3.bf16.msra.mxu0 %v634_v30 }
  0x3e   :  { %573 = vmatprep.subr.bf16.mxu0 %v635_v31 }
  0x40   :  { %253 = vmatpush1.bf16.msra.mxu1 %v620_v17 }
  0x41   :  { %254 = vmatprep.subr.bf16.mxu1 %v621_v18  ;;  %574 = vmatpush3.bf16.msra.mxu0 %v636_v32 }
  0x42   :  { %575 = vmatprep.subr.bf16.mxu0 %v637_v33 }
  0x44   :  { %255 = vmatpush1.bf16.msra.mxu1 %v623_v19 }
  0x45   :  { %256 = vmatprep.subr.bf16.mxu1 %v624_v20  ;;  %576 = vmatpush3.bf16.msra.mxu0 %v638_v34 }
  0x46   :  { %577 = vmatprep.subr.bf16.mxu0 %v639_v43 }
  0x48   :  { %257 = vmatpush1.bf16.msra.mxu1 %v626_v21 }
  0x49   :  { %578 = vmatpush3.bf16.msra.mxu0 %v640_v44 }
  0x4a   :  { %579 = vmatprep.subr.bf16.mxu0 %v641_v45 }
  0x4d   :  { %580 = vmatpush3.bf16.msra.mxu0 %v642_v46 }
  0xee   :  { %v126_v36 = vpop.f32.mrf.mxu0 }
  0xef   :  { %v127_v37 = vadd.f32 %v526_v35, %v126_v36 }
  0xf0   :  { %v591_v38 = vpop.f32.mrf.mxu0 }
  0xf1   :  { %v132_v39 = vmax.f32 %v127_v37, 0.0 }
  0xf2   :  { %v129_v40 = vpop.f32.mrf.mxu0 }
  0xf3   :  { %v133_v41 = vpack.c.bf16 %v132_v39, %v132_v39 }
  0xf4   :  { %v592_v42 = vpop.f32.mrf.mxu0 }
  0xf5   :  { %275 = vmatmul.mubr.bf16.vlgmr.msra.gmra.mxu1 %v133_v41 }
 0x1b5   :  { %v276_v54 = vpop.f32.mrf.mxu1 }
 0x1b6   :  { %v277_v55 = vadd.f32 %v276_v54, %v155_v52 }
 0x1b7   :  { %v278_v56 = vpop.f32.mrf.mxu1 }
 0x1b8   :  { %v279_v57 = vadd.f32 %v278_v56, %v159_v53  ;;  %v283_v58 = vmax.f32 %v277_v55, 0.0 }
 0x1b9   :  { %v280_v59 = vpop.f32.mrf.mxu1 }
 0x1ba   :  { %v284_v60 = vmax.f32 %v279_v57, 0.0  ;;  %v285_v63 = vpack.c.bf16 %v283_v58, %v283_v58 }
 0x1bb   :  { %v281_v61 = vpop.f32.mrf.mxu1 }
 0x1bc   :  { %v286_v62 = vpack.c.bf16 %v284_v60, %v284_v60 }
 0x1be   :  { %454 = vmatprep.mubr.bf16.mxu0 %v286_v62 }
 0x1bf   :  { %455 = vmatmul.mubr.bf16.vlgmr.msra.gmra.mxu0 %v285_v63 }
 0x27f   :  { %v581_v0 = vpop.f32.mrf.mxu0 }
 0x281   :  { %v582_v1 = vpop.f32.mrf.mxu0 }
 0x282   :  { %v583_v3 = vadd.f32 %v582_v1, %v581_v0 }
 0x283   :  { %v584_v4 = vpop.f32.mrf.mxu0 }
 0x284   :  { %v457_v5 = vadd.f32 %v583_v3, %v544_v2 }
 0x285   :  { %v585_v6 = vpop.f32.mrf.mxu0 }
 0x286   :  { %v462_v8 = vmax.f32 %v457_v5, 0.0 }
 0x288   :  { %v470_v9 = vmul.f32 %v561_v7, %v462_v8 }
 0x28a   :  { %471 = vadd.xlane.f32.xlu0 %v470_v9 }
 0x313   :  { %v472_v11 = vpop.xlane.xlu0 %471 }
 0x314   :  { %v480_v12 = vadd.f32 %v562_v10, %v472_v11 }
 0x316   :  { %482 = vst.msk [vmem:[#allocation8] sm:$0xff] %vm481_vm3, %v480_v12 }
 0x31d   :  { %v501_v13 = vld [vmem:[#allocation8] sm:$0x3] }
 0x31e   :  { %502 = vst [vmem:[%s806_s9] sm:$0x3] %v501_v13 }
 0x31f   :  { %520 = vsyncpa [#allocation4], 1 }
 0x320   :  { %521 = vsyncpa [#allocation6], 1 }

</bundles_post_ra>
